<compile_context>
chip_gen: v6e
topology: v6e:2x2x1
jax: 0.10.0
libtpu: 0.0.40
codegen_flags: <defaults>
</compile_context>

<pallas_src>
import functools

import jax
import jax.numpy as jnp
from jax.experimental import pallas as pl
from jax.experimental.pallas import tpu as pltpu
from jax.scipy.special import logsumexp

_LARGE_NUM = 1000000000.0


def _contrastive_loss_kernel(*refs, has_mask, inv_t, large_num):
    if has_mask:
        (q_ref, k_ref, mask_ref, acc_out_ref, col_out_ref,
         kn_hi_ref, kn_lo_ref, mcol_ref, lcol_ref, acc_ref) = refs
        kn_f32_ref = None
    else:
        (q_ref, k_ref, acc_out_ref, col_out_ref,
         kn_hi_ref, kn_lo_ref, kn_f32_ref, mcol_ref, lcol_ref, acc_ref) = refs
        mask_ref = None

    s = pl.program_id(0)              # row half (parallel -> megacore-shardable on v7x)
    j = pl.program_id(1)              # row tile inside the half (reduction axis)
    n_inner = pl.num_programs(1)

    @pl.when(j == 0)
    def _init():
        # Hoisted: normalize k once per (core, half); kept VMEM-resident as a bf16
        # hi/lo pair (manual bf16x3 operands for the MXU).
        kf = k_ref[...].astype(jnp.float32)
        kn = kf * jax.lax.rsqrt(jnp.sum(kf * kf, axis=-1, keepdims=True))
        hi = kn.astype(jnp.bfloat16)
        kn_hi_ref[...] = hi
        kn_lo_ref[...] = (kn - hi.astype(jnp.float32)).astype(jnp.bfloat16)
        if kn_f32_ref is not None:
            kn_f32_ref[...] = kn      # used only for the cheap diagonal slices
        mcol_ref[...] = jnp.full_like(mcol_ref, -jnp.inf)
        lcol_ref[...] = jnp.zeros_like(lcol_ref)
        acc_ref[...] = jnp.zeros_like(acc_ref)

    # Row-normalize the q tile in f32 (rsqrt -> EUP), split into bf16 hi/lo.
    q = q_ref[...].astype(jnp.float32)                                   # (tn, D)
    qn = q * jax.lax.rsqrt(jnp.sum(q * q, axis=-1, keepdims=True))
    q_hi = qn.astype(jnp.bfloat16)
    q_lo = (qn - q_hi.astype(jnp.float32)).astype(jnp.bfloat16)

    # (tn, N) logits tile: 3 single-pass bf16 MXU matmuls, f32 accumulation (bf16x3).
    dims = (((1,), (1,)), ((), ()))
    k_hi = kn_hi_ref[...]
    k_lo = kn_lo_ref[...]
    logits = jax.lax.dot_general(q_hi, k_hi, dims, preferred_element_type=jnp.float32)
    logits = logits + jax.lax.dot_general(q_hi, k_lo, dims,
                                          preferred_element_type=jnp.float32)
    logits = logits + jax.lax.dot_general(q_lo, k_hi, dims,
                                          preferred_element_type=jnp.float32)
    out = logits * inv_t

    tn, nn = out.shape
    row_start = (s * n_inner + j) * tn            # global row offset of this tile

    if has_mask:
        out = out - large_num * mask_ref[...].astype(jnp.float32)
        # Positive (diagonal) logits include the mask term -> extract from `out`.
        row_ids = jax.lax.broadcasted_iota(jnp.int32, (tn, nn), 0)
        col_ids = jax.lax.broadcasted_iota(jnp.int32, (tn, nn), 1)
        diag = jnp.sum(jnp.where(col_ids == row_ids + row_start, out, 0.0),
                       axis=-1, keepdims=True)                           # (tn, 1)
    else:
        # Cheap diagonal: qn[r] . kn[row_start + r] -- no full-width iotas / select.
        rs = pl.multiple_of(row_start, 8)
        kn_tile = kn_f32_ref[pl.ds(rs, tn), :]                           # (tn, D)
        diag = jnp.sum(qn * kn_tile, axis=-1, keepdims=True) * inv_t     # (tn, 1)

    # One exp shared between the two softmax directions.
    row_max = jnp.max(out, axis=-1, keepdims=True)                       # (tn, 1)
    p = jnp.exp(out - row_max)                                           # (tn, N)
    row_lse = row_max + jnp.log(jnp.sum(p, axis=-1, keepdims=True))      # (tn, 1)
    acc_ref[...] += 0.5 * row_lse - diag

    # Online column exp-sums against a single running scalar max M.
    m_old = mcol_ref[...]                                                # (1, 1)
    m_new = jnp.maximum(m_old, jnp.max(row_max, axis=0, keepdims=True))  # (1, 1)
    w = jnp.exp(row_max - m_new)                                         # (tn, 1)
    lcol_ref[...] = (lcol_ref[...] * jnp.exp(m_old - m_new)
                     + jnp.sum(p * w, axis=0, keepdims=True))            # (1, N)
    mcol_ref[...] = m_new

    @pl.when(j == n_inner - 1)
    def _finalize():
        acc_out_ref[...] = jnp.sum(acc_ref[...]).reshape(1, 1, 1)
        col_out_ref[...] = (mcol_ref[...] + jnp.log(lcol_ref[...])).reshape(1, 1, nn)


def _device_vmem_capacity():
    kind = ""
    try:
        kind = jax.devices()[0].device_kind.lower()
    except Exception:
        pass
    if "7" in kind:                    # v7x: 64 MiB VMEM per TensorCore
        return 64 << 20
    if "v2" in kind or "v3" in kind:   # very old chips: small VMEM
        return 16 << 20
    return 128 << 20                   # v4 / v5e / v5p / v6e


def _vmem_need_bytes(tile_n, n, d, q_isize, k_isize, has_mask):
    need = 2 * n * d * k_isize            # k input (double-buffered, block-invariant)
    need += 2 * n * d * 2                 # kn hi/lo bf16 scratch
    if not has_mask:
        need += n * d * 4                 # kn f32 scratch (diagonal slice source)
    need += 2 * tile_n * d * q_isize      # q tile (double-buffered)
    if has_mask:
        need += 2 * tile_n * n * 2        # bf16 mask tile (double-buffered)
    live = 8 if has_mask else 6           # live (tile_n, N) f32 temporaries (generous)
    need += live * tile_n * n * 4
    need += (2 * n + 4 * tile_n + 1024) * 4
    return need


def _pick_tile_n(n, d, q_isize, k_isize, has_mask, gran, budget, cap):
    """Largest multiple of `gran` dividing n that fits the VMEM budget (<= cap)."""
    if n % gran != 0 or n <= gran:
        return n
    best = gran
    t = gran
    limit = min(n, cap)
    while t <= limit:
        if n % t == 0 and _vmem_need_bytes(t, n, d, q_isize, k_isize, has_mask) <= budget:
            best = t
        t += gran
    return best


def contrastive_loss(q, k, nce_t, mask=None, *, tile_n=None):
    """q, k: (N, D); mask: optional (N, N) {0,1}; returns scalar loss (f32)."""
    n, d = q.shape
    assert k.shape == (n, d), (q.shape, k.shape)
    has_mask = mask is not None
    if has_mask:
        assert mask.shape == (n, n), mask.shape
        if mask.dtype != jnp.bfloat16:
            # Keep the N^2 mask stream narrow on the wire (0/1 is exact in bf16);
            # the upcast to f32 happens in-kernel.
            mask = mask.astype(jnp.bfloat16)

    q_isize = q.dtype.itemsize
    k_isize = k.dtype.itemsize
    gran = 8
    if q_isize == 2:
        gran = 16
    if has_mask:
        gran = max(gran, 16)              # bf16 mask block: (16, 128) min tile

    capacity = _device_vmem_capacity()
    budget = int(capacity * 0.78)         # scoped-VMEM target used to pick tile_n
    cap = 1024 if capacity >= (128 << 20) else 512

    if tile_n is None:
        tile_n = _pick_tile_n(n, d, q_isize, k_isize, has_mask, gran, budget, cap)
    assert tile_n == n or (n % tile_n == 0 and tile_n % gran == 0), (n, tile_n, gran)

    n_tiles = max(n // tile_n, 1)
    # 2-way row split on a leading "parallel" axis: Mosaic can shard it across the two
    # TensorCores on v7x; on single-core chips it simply runs sequentially.  Per-half
    # partial results are combined in a tiny JAX epilogue below.
    n_split = 2 if (n_tiles % 2 == 0 and n_tiles >= 2) else 1
    n_inner = n_tiles // n_split

    in_specs = [
        pl.BlockSpec((tile_n, d), lambda s, j: (s * n_inner + j, 0)),  # q row tile
        pl.BlockSpec((n, d), lambda s, j: (0, 0)),                     # full k (resident)
    ]
    args = [q, k]
    if has_mask:
        in_specs.append(pl.BlockSpec((tile_n, n), lambda s, j: (s * n_inner + j, 0)))
        args.append(mask)

    out_shape = (jax.ShapeDtypeStruct((n_split, 1, 1), jnp.float32),
                 jax.ShapeDtypeStruct((n_split, 1, n), jnp.float32))
    out_specs = [pl.BlockSpec((1, 1, 1), lambda s, j: (s, 0, 0)),
                 pl.BlockSpec((1, 1, n), lambda s, j: (s, 0, 0))]

    scratch_shapes = [
        pltpu.VMEM((n, d), jnp.bfloat16),          # kn hi
        pltpu.VMEM((n, d), jnp.bfloat16),          # kn lo
    ]
    if not has_mask:
        scratch_shapes.append(pltpu.VMEM((n, d), jnp.float32))   # kn f32 (diag slices)
    scratch_shapes += [
        pltpu.VMEM((1, 1), jnp.float32),           # running column max (scalar M)
        pltpu.VMEM((1, n), jnp.float32),           # running column exp-sums at scale M
        pltpu.VMEM((tile_n, 1), jnp.float32),      # per-row partials: 0.5*row_lse - diag
    ]

    need = _vmem_need_bytes(tile_n, n, d, q_isize, k_isize, has_mask)
    clamp = int(capacity * 0.82)                   # headroom for compiler-internal scratch
    vmem_limit = min(max(need + (8 << 20), 32 << 20), clamp)

    mask_bytes = (n * n * 2) if has_mask else 0
    cost = pl.CostEstimate(
        flops=6 * n * n * d + 12 * n * n,
        transcendentals=n * n + 6 * n,
        bytes_accessed=(q.size * q_isize + k.size * k_isize + mask_bytes
                        + 4 * n_split * (n + 1)),
    )

    kernel = functools.partial(
        _contrastive_loss_kernel,
        has_mask=has_mask,
        inv_t=float(1.0 / nce_t),
        large_num=_LARGE_NUM,
    )

    acc_parts, col_parts = pl.pallas_call(
        kernel,
        out_shape=out_shape,
        grid_spec=pltpu.PrefetchScalarGridSpec(
            num_scalar_prefetch=0,
            grid=(n_split, n_inner),
            in_specs=in_specs,
            out_specs=out_specs,
            scratch_shapes=scratch_shapes,
        ),
        compiler_params=pltpu.CompilerParams(
            dimension_semantics=("parallel", "arbitrary"),
            vmem_limit_bytes=int(vmem_limit),
        ),
        cost_estimate=cost,
    )(*args)

    # Tiny epilogue: combine the per-half column logsumexps and row partial sums.
    col_lse = logsumexp(col_parts[:, 0, :], axis=0)          # (n,)
    total = jnp.sum(acc_parts) + 0.5 * jnp.sum(col_lse)
    return total / n


def contrastive_loss_ref(q, k, nce_t, mask=None):
    """Pure-JAX reference matching the PyTorch module."""
    qn = q / jnp.linalg.norm(q, axis=1, keepdims=True)
    kn = k / jnp.linalg.norm(k, axis=1, keepdims=True)
    out = jnp.matmul(qn, kn.T, precision=jax.lax.Precision.HIGHEST) / nce_t
    if mask is not None:
        out = out - _LARGE_NUM * mask.astype(jnp.float32)
    diag = jnp.diagonal(out)
    loss1 = jnp.mean(logsumexp(out, axis=1) - diag)
    loss2 = jnp.mean(logsumexp(out, axis=0) - diag)
    return 0.5 * (loss1 + loss2)


if __name__ == "__main__":
    key = jax.random.PRNGKey(0)
    kq, kk, km, kq2, kk2, km2 = jax.random.split(key, 6)

    nce_t = 0.07  # NCE temperature (module __init__ arg)

    # --- no-mask path; small tile forces the (2-way split x inner) accumulation grid.
    N, D = 16, 32
    q = jax.random.normal(kq, (N, D), dtype=jnp.float32)
    k = jax.random.normal(kk, (N, D), dtype=jnp.float32)
    loss = contrastive_loss(q, k, nce_t, tile_n=8)
    jax.block_until_ready(loss)
    ref = contrastive_loss_ref(q, k, nce_t)
    assert jnp.allclose(loss, ref, atol=1e-3, rtol=1e-3), (loss, ref)

    # --- masked path, single tile (positives on the diagonal stay unmasked).
    mask = (jax.random.uniform(km, (N, N)) < 0.2).astype(jnp.float32)
    mask = mask * (1.0 - jnp.eye(N, dtype=jnp.float32))
    loss_m = contrastive_loss(q, k, nce_t, mask=mask)
    jax.block_until_ready(loss_m)
    ref_m = contrastive_loss_ref(q, k, nce_t, mask=mask)
    assert jnp.allclose(loss_m, ref_m, atol=1e-3, rtol=1e-3), (loss_m, ref_m)

    # --- masked path, multi-tile grid (exercises the online column accumulation + split).
    N2, D2 = 64, 32
    q2 = jax.random.normal(kq2, (N2, D2), dtype=jnp.float32)
    k2 = jax.random.normal(kk2, (N2, D2), dtype=jnp.float32)
    mask2 = (jax.random.uniform(km2, (N2, N2)) < 0.2).astype(jnp.float32)
    mask2 = mask2 * (1.0 - jnp.eye(N2, dtype=jnp.float32))
    loss_m2 = contrastive_loss(q2, k2, nce_t, mask=mask2, tile_n=16)
    jax.block_until_ready(loss_m2)
    ref_m2 = contrastive_loss_ref(q2, k2, nce_t, mask=mask2)
    assert jnp.allclose(loss_m2, ref_m2, atol=1e-3, rtol=1e-3), (loss_m2, ref_m2)

    print("KERNEL_OK")
</pallas_src>

<mosaic_0001>
module attributes {stable_mosaic.version = 11 : i64} {
  func.func @_contrastive_loss_kernel(%arg0: i32, %arg1: i32, %arg2: memref<8x32xf32, #tpu.memory_space<vmem>>, %arg3: memref<16x32xf32, #tpu.memory_space<vmem>>, %arg4: memref<1x1x1xf32, #tpu.memory_space<vmem>>, %arg5: memref<1x1x16xf32, #tpu.memory_space<vmem>>, %arg6: memref<16x32xbf16, #tpu.memory_space<vmem>>, %arg7: memref<16x32xbf16, #tpu.memory_space<vmem>>, %arg8: memref<16x32xf32, #tpu.memory_space<vmem>>, %arg9: memref<1x1xf32, #tpu.memory_space<vmem>>, %arg10: memref<1x16xf32, #tpu.memory_space<vmem>>, %arg11: memref<8x1xf32, #tpu.memory_space<vmem>>) attributes {dimension_semantics = [#tpu.dimension_semantics<parallel>, #tpu.dimension_semantics<arbitrary>], iteration_bounds = array<i64: 2, 1>, scalar_prefetch = 0 : i64, scratch_operands = 6 : i64, tpu.core_type = #tpu.core_type<tc>, window_params = [{transform_indices = @transform_0, window_bounds = array<i64: 8, 32>}, {pipeline_mode = #tpu.pipeline_mode<synchronous>, transform_indices = @transform_1, window_bounds = array<i64: 16, 32>}, {transform_indices = @transform_2, window_bounds = array<i64: 1, 1, 1>}, {transform_indices = @transform_3, window_bounds = array<i64: 1, 1, 16>}]} {
    %c0_i32 = arith.constant 0 : i32
    %0 = arith.cmpi eq, %arg1, %c0_i32 : i32
    %1 = arith.extui %0 : i1 to i32
    %c0_i32_0 = arith.constant 0 : i32
    %2 = arith.cmpi ne, %1, %c0_i32_0 : i32
    scf.if %2 {
      %c0_32 = arith.constant 0 : index
      %c0_33 = arith.constant 0 : index
      %71 = vector.load %arg3[%c0_32, %c0_33] : memref<16x32xf32, #tpu.memory_space<vmem>>, vector<16x32xf32>
      %72 = arith.mulf %71, %71 : vector<16x32xf32>
      %cst_34 = arith.constant dense<0.000000e+00> : vector<16xf32>
      %73 = vector.multi_reduction <add>, %72, %cst_34 [1] : vector<16x32xf32> to vector<16xf32>
      %74 = vector.shape_cast %73 : vector<16xf32> to vector<16x1xf32>
      %75 = math.rsqrt %74 : vector<16x1xf32>
      %76 = vector.broadcast %75 : vector<16x1xf32> to vector<16x32xf32>
      %77 = arith.mulf %71, %76 : vector<16x32xf32>
      %78 = arith.truncf %77 : vector<16x32xf32> to vector<16x32xbf16>
      %c0_35 = arith.constant 0 : index
      %c0_36 = arith.constant 0 : index
      %79 = vector.load %arg6[%c0_35, %c0_36] : memref<16x32xbf16, #tpu.memory_space<vmem>>, vector<16x32xbf16>
      tpu.vector_store %arg6[%c0_35, %c0_36], %78 {strides = array<i32>} : memref<16x32xbf16, #tpu.memory_space<vmem>>, vector<16x32xbf16>,
      %80 = arith.extf %78 : vector<16x32xbf16> to vector<16x32xf32>
      %81 = arith.subf %77, %80 : vector<16x32xf32>
      %82 = arith.truncf %81 : vector<16x32xf32> to vector<16x32xbf16>
      %c0_37 = arith.constant 0 : index
      %c0_38 = arith.constant 0 : index
      %83 = vector.load %arg7[%c0_37, %c0_38] : memref<16x32xbf16, #tpu.memory_space<vmem>>, vector<16x32xbf16>
      tpu.vector_store %arg7[%c0_37, %c0_38], %82 {strides = array<i32>} : memref<16x32xbf16, #tpu.memory_space<vmem>>, vector<16x32xbf16>,
      %c0_39 = arith.constant 0 : index
      %c0_40 = arith.constant 0 : index
      %84 = vector.load %arg8[%c0_39, %c0_40] : memref<16x32xf32, #tpu.memory_space<vmem>>, vector<16x32xf32>
      tpu.vector_store %arg8[%c0_39, %c0_40], %77 {strides = array<i32>} : memref<16x32xf32, #tpu.memory_space<vmem>>, vector<16x32xf32>,
      %cst_41 = arith.constant 0xFF800000 : f32
      %85 = vector.broadcast %cst_41 : f32 to vector<1x1xf32>
      %c0_42 = arith.constant 0 : index
      %c0_43 = arith.constant 0 : index
      %86 = vector.load %arg9[%c0_42, %c0_43] : memref<1x1xf32, #tpu.memory_space<vmem>>, vector<1x1xf32>
      tpu.vector_store %arg9[%c0_42, %c0_43], %85 {strides = array<i32>} : memref<1x1xf32, #tpu.memory_space<vmem>>, vector<1x1xf32>,
      %cst_44 = arith.constant 0.000000e+00 : f32
      %87 = vector.broadcast %cst_44 : f32 to vector<1x16xf32>
      %c0_45 = arith.constant 0 : index
      %c0_46 = arith.constant 0 : index
      %88 = vector.load %arg10[%c0_45, %c0_46] : memref<1x16xf32, #tpu.memory_space<vmem>>, vector<1x16xf32>
      tpu.vector_store %arg10[%c0_45, %c0_46], %87 {strides = array<i32>} : memref<1x16xf32, #tpu.memory_space<vmem>>, vector<1x16xf32>,
      %cst_47 = arith.constant 0.000000e+00 : f32
      %89 = vector.broadcast %cst_47 : f32 to vector<8x1xf32>
      %c0_48 = arith.constant 0 : index
      %c0_49 = arith.constant 0 : index
      %90 = vector.load %arg11[%c0_48, %c0_49] : memref<8x1xf32, #tpu.memory_space<vmem>>, vector<8x1xf32>
      tpu.vector_store %arg11[%c0_48, %c0_49], %89 {strides = array<i32>} : memref<8x1xf32, #tpu.memory_space<vmem>>, vector<8x1xf32>,
    } else {
    }
    %c0 = arith.constant 0 : index
    %c0_1 = arith.constant 0 : index
    %3 = vector.load %arg2[%c0, %c0_1] : memref<8x32xf32, #tpu.memory_space<vmem>>, vector<8x32xf32>
    %4 = arith.mulf %3, %3 : vector<8x32xf32>
    %cst = arith.constant dense<0.000000e+00> : vector<8xf32>
    %5 = vector.multi_reduction <add>, %4, %cst [1] : vector<8x32xf32> to vector<8xf32>
    %6 = vector.shape_cast %5 : vector<8xf32> to vector<8x1xf32>
    %7 = math.rsqrt %6 : vector<8x1xf32>
    %8 = vector.broadcast %7 : vector<8x1xf32> to vector<8x32xf32>
    %9 = arith.mulf %3, %8 : vector<8x32xf32>
    %10 = arith.truncf %9 : vector<8x32xf32> to vector<8x32xbf16>
    %11 = arith.extf %10 : vector<8x32xbf16> to vector<8x32xf32>
    %12 = arith.subf %9, %11 : vector<8x32xf32>
    %13 = arith.truncf %12 : vector<8x32xf32> to vector<8x32xbf16>
    %c0_2 = arith.constant 0 : index
    %c0_3 = arith.constant 0 : index
    %14 = vector.load %arg6[%c0_2, %c0_3] : memref<16x32xbf16, #tpu.memory_space<vmem>>, vector<16x32xbf16>
    %c0_4 = arith.constant 0 : index
    %c0_5 = arith.constant 0 : index
    %15 = vector.load %arg7[%c0_4, %c0_5] : memref<16x32xbf16, #tpu.memory_space<vmem>>, vector<16x32xbf16>
    %cst_6 = arith.constant dense<0.000000e+00> : vector<8x16xf32>
    %16 = tpu.matmul %10, %14, %cst_6 {dimension_numbers = #tpu.dot_dimension_numbers<[1], [1], [0], [0], [0, 0, 1, 0], [], []>} : vector<8x32xbf16>, vector<16x32xbf16>, vector<8x16xf32> -> vector<8x16xf32>
    %cst_7 = arith.constant dense<0.000000e+00> : vector<8x16xf32>
    %17 = tpu.matmul %10, %15, %cst_7 {dimension_numbers = #tpu.dot_dimension_numbers<[1], [1], [0], [0], [0, 0, 1, 0], [], []>} : vector<8x32xbf16>, vector<16x32xbf16>, vector<8x16xf32> -> vector<8x16xf32>
    %18 = arith.addf %16, %17 : vector<8x16xf32>
    %cst_8 = arith.constant dense<0.000000e+00> : vector<8x16xf32>
    %19 = tpu.matmul %13, %14, %cst_8 {dimension_numbers = #tpu.dot_dimension_numbers<[1], [1], [0], [0], [0, 0, 1, 0], [], []>} : vector<8x32xbf16>, vector<16x32xbf16>, vector<8x16xf32> -> vector<8x16xf32>
    %20 = arith.addf %18, %19 : vector<8x16xf32>
    %cst_9 = arith.constant 14.2857141 : f32
    %21 = vector.broadcast %cst_9 : f32 to vector<8x16xf32>
    %22 = arith.mulf %20, %21 : vector<8x16xf32>
    %c1_i32 = arith.constant 1 : i32
    %23 = arith.muli %arg0, %c1_i32 : i32
    %24 = arith.addi %23, %arg1 : i32
    %c8_i32 = arith.constant 8 : i32
    %25 = arith.muli %24, %c8_i32 : i32
    %26 = tpu.assume_multiple %25, 8 : i32
    %27 = arith.index_cast %26 : i32 to index
    %c0_10 = arith.constant 0 : index
    %28 = vector.load %arg8[%27, %c0_10] : memref<16x32xf32, #tpu.memory_space<vmem>>, vector<8x32xf32>
    %29 = arith.mulf %9, %28 : vector<8x32xf32>
    %cst_11 = arith.constant dense<0.000000e+00> : vector<8xf32>
    %30 = vector.multi_reduction <add>, %29, %cst_11 [1] : vector<8x32xf32> to vector<8xf32>
    %31 = vector.shape_cast %30 : vector<8xf32> to vector<8x1xf32>
    %cst_12 = arith.constant 14.2857141 : f32
    %32 = vector.broadcast %cst_12 : f32 to vector<8x1xf32>
    %33 = arith.mulf %31, %32 : vector<8x1xf32>
    %cst_13 = arith.constant dense<0xFF800000> : vector<8xf32>
    %34 = vector.multi_reduction <maximumf>, %22, %cst_13 [1] : vector<8x16xf32> to vector<8xf32>
    %35 = vector.shape_cast %34 : vector<8xf32> to vector<8x1xf32>
    %36 = vector.broadcast %35 : vector<8x1xf32> to vector<8x16xf32>
    %37 = arith.subf %22, %36 : vector<8x16xf32>
    %38 = math.exp %37 : vector<8x16xf32>
    %cst_14 = arith.constant dense<0.000000e+00> : vector<8xf32>
    %39 = vector.multi_reduction <add>, %38, %cst_14 [1] : vector<8x16xf32> to vector<8xf32>
    %40 = vector.shape_cast %39 : vector<8xf32> to vector<8x1xf32>
    %41 = math.log %40 : vector<8x1xf32>
    %42 = arith.addf %35, %41 : vector<8x1xf32>
    %c0_15 = arith.constant 0 : index
    %c0_16 = arith.constant 0 : index
    %43 = vector.load %arg11[%c0_15, %c0_16] : memref<8x1xf32, #tpu.memory_space<vmem>>, vector<8x1xf32>
    %cst_17 = arith.constant 5.000000e-01 : f32
    %44 = vector.broadcast %cst_17 : f32 to vector<8x1xf32>
    %45 = arith.mulf %44, %42 : vector<8x1xf32>
    %46 = arith.subf %45, %33 : vector<8x1xf32>
    %47 = arith.addf %43, %46 : vector<8x1xf32>
    %c0_18 = arith.constant 0 : index
    %c0_19 = arith.constant 0 : index
    %48 = vector.load %arg11[%c0_18, %c0_19] : memref<8x1xf32, #tpu.memory_space<vmem>>, vector<8x1xf32>
    tpu.vector_store %arg11[%c0_18, %c0_19], %47 {strides = array<i32>} : memref<8x1xf32, #tpu.memory_space<vmem>>, vector<8x1xf32>,
    %c0_20 = arith.constant 0 : index
    %c0_21 = arith.constant 0 : index
    %49 = vector.load %arg9[%c0_20, %c0_21] : memref<1x1xf32, #tpu.memory_space<vmem>>, vector<1x1xf32>
    %cst_22 = arith.constant dense<0xFF800000> : vector<1xf32>
    %50 = vector.multi_reduction <maximumf>, %35, %cst_22 [0] : vector<8x1xf32> to vector<1xf32>
    %51 = vector.shape_cast %50 : vector<1xf32> to vector<1x1xf32>
    %52 = arith.maximumf %49, %51 : vector<1x1xf32>
    %53 = vector.broadcast %52 : vector<1x1xf32> to vector<8x1xf32>
    %54 = arith.subf %35, %53 : vector<8x1xf32>
    %55 = math.exp %54 : vector<8x1xf32>
    %c0_23 = arith.constant 0 : index
    %c0_24 = arith.constant 0 : index
    %56 = vector.load %arg10[%c0_23, %c0_24] : memref<1x16xf32, #tpu.memory_space<vmem>>, vector<1x16xf32>
    %57 = arith.subf %49, %52 : vector<1x1xf32>
    %58 = math.exp %57 : vector<1x1xf32>
    %59 = vector.broadcast %58 : vector<1x1xf32> to vector<1x16xf32>
    %60 = arith.mulf %56, %59 : vector<1x16xf32>
    %61 = vector.broadcast %55 : vector<8x1xf32> to vector<8x16xf32>
    %62 = arith.mulf %38, %61 : vector<8x16xf32>
    %cst_25 = arith.constant dense<0.000000e+00> : vector<16xf32>
    %63 = vector.multi_reduction <add>, %62, %cst_25 [0] : vector<8x16xf32> to vector<16xf32>
    %64 = vector.shape_cast %63 : vector<16xf32> to vector<1x16xf32>
    %65 = arith.addf %60, %64 : vector<1x16xf32>
    %c0_26 = arith.constant 0 : index
    %c0_27 = arith.constant 0 : index
    %66 = vector.load %arg10[%c0_26, %c0_27] : memref<1x16xf32, #tpu.memory_space<vmem>>, vector<1x16xf32>
    tpu.vector_store %arg10[%c0_26, %c0_27], %65 {strides = array<i32>} : memref<1x16xf32, #tpu.memory_space<vmem>>, vector<1x16xf32>,
    %c0_28 = arith.constant 0 : index
    %c0_29 = arith.constant 0 : index
    %67 = vector.load %arg9[%c0_28, %c0_29] : memref<1x1xf32, #tpu.memory_space<vmem>>, vector<1x1xf32>
    tpu.vector_store %arg9[%c0_28, %c0_29], %52 {strides = array<i32>} : memref<1x1xf32, #tpu.memory_space<vmem>>, vector<1x1xf32>,
    %c0_i32_30 = arith.constant 0 : i32
    %68 = arith.cmpi eq, %arg1, %c0_i32_30 : i32
    %69 = arith.extui %68 : i1 to i32
    %c0_i32_31 = arith.constant 0 : i32
    %70 = arith.cmpi ne, %69, %c0_i32_31 : i32
    scf.if %70 {
      %c0_32 = arith.constant 0 : index
      %c0_33 = arith.constant 0 : index
      %71 = vector.load %arg11[%c0_32, %c0_33] : memref<8x1xf32, #tpu.memory_space<vmem>>, vector<8x1xf32>
      %72 = vector.shape_cast %71 : vector<8x1xf32> to vector<1x8x1xf32>
      %cst_34 = arith.constant dense<0.000000e+00> : vector<1xf32>
      %73 = vector.multi_reduction <add>, %72, %cst_34 [1, 2] : vector<1x8x1xf32> to vector<1xf32>
      %74 = vector.shape_cast %73 : vector<1xf32> to vector<1x1x1xf32>
      %75 = vector.extract %74[0, 0, 0] : f32 from vector<1x1x1xf32>
      %76 = vector.broadcast %75 : f32 to vector<1x1x1xf32>
      %c0_35 = arith.constant 0 : index
      %c0_36 = arith.constant 0 : index
      %c0_37 = arith.constant 0 : index
      %77 = vector.load %arg4[%c0_35, %c0_36, %c0_37] : memref<1x1x1xf32, #tpu.memory_space<vmem>>, vector<1x1x1xf32>
      tpu.vector_store %arg4[%c0_35, %c0_36, %c0_37], %76 {strides = array<i32>} : memref<1x1x1xf32, #tpu.memory_space<vmem>>, vector<1x1x1xf32>,
      %c0_38 = arith.constant 0 : index
      %c0_39 = arith.constant 0 : index
      %78 = vector.load %arg9[%c0_38, %c0_39] : memref<1x1xf32, #tpu.memory_space<vmem>>, vector<1x1xf32>
      %c0_40 = arith.constant 0 : index
      %c0_41 = arith.constant 0 : index
      %79 = vector.load %arg10[%c0_40, %c0_41] : memref<1x16xf32, #tpu.memory_space<vmem>>, vector<1x16xf32>
      %80 = math.log %79 : vector<1x16xf32>
      %81 = vector.broadcast %78 : vector<1x1xf32> to vector<1x16xf32>
      %82 = arith.addf %81, %80 : vector<1x16xf32>
      %83 = vector.shape_cast %82 : vector<1x16xf32> to vector<1x1x16xf32>
      %c0_42 = arith.constant 0 : index
      %c0_43 = arith.constant 0 : index
      %c0_44 = arith.constant 0 : index
      %84 = vector.load %arg5[%c0_42, %c0_43, %c0_44] : memref<1x1x16xf32, #tpu.memory_space<vmem>>, vector<1x1x16xf32>
      tpu.vector_store %arg5[%c0_42, %c0_43, %c0_44], %83 {strides = array<i32>} : memref<1x1x16xf32, #tpu.memory_space<vmem>>, vector<1x1x16xf32>,
    } else {
    }
    return
  }
  func.func @transform_0(%arg0: i32, %arg1: i32) -> (i32, i32) {
    %c1_i32 = arith.constant 1 : i32
    %0 = arith.muli %arg0, %c1_i32 : i32
    %1 = arith.addi %0, %arg1 : i32
    %c0_i32 = arith.constant 0 : i32
    %c0_i32_0 = arith.constant 0 : i32
    return %1, %c0_i32 : i32, i32
  }
  func.func @transform_1(%arg0: i32, %arg1: i32) -> (i32, i32) {
    %c0_i32 = arith.constant 0 : i32
    %c0_i32_0 = arith.constant 0 : i32
    %c0_i32_1 = arith.constant 0 : i32
    return %c0_i32, %c0_i32_0 : i32, i32
  }
  func.func @transform_2(%arg0: i32, %arg1: i32) -> (i32, i32, i32) {
    %c0_i32 = arith.constant 0 : i32
    %c0_i32_0 = arith.constant 0 : i32
    %c0_i32_1 = arith.constant 0 : i32
    return %arg0, %c0_i32, %c0_i32_0 : i32, i32, i32
  }
  func.func @transform_3(%arg0: i32, %arg1: i32) -> (i32, i32, i32) {
    %c0_i32 = arith.constant 0 : i32
    %c0_i32_0 = arith.constant 0 : i32
    %c0_i32_1 = arith.constant 0 : i32
    return %arg0, %c0_i32, %c0_i32_0 : i32, i32, i32
  }
}

</mosaic_0001>

<bundles_post_ra>
// kernel: tpu_custom_call.1
= control target key start
LH: loop header
LB: loop body
LE: loop exit
PB: predicated region body
PF: predicated region fallthrough
CT: control target
= control target key end

     0   :  { %9 = vsyncpa [#allocation9], 0  ;;  %s1207_s0 = inlined_call_operand.hbm [shape: f32[16,32], index: 0, kind: input, shape index: {}]   ;;  %s1208_s1 = inlined_call_operand.hbm [shape: f32[16,32], index: 1, kind: input, shape index: {}]   ;;  %s1209_s2 = inlined_call_operand.vmem [shape: f32[2,1,1], index: 2, kind: output, shape index: {0}]   ;;  %s1210_s3 = inlined_call_operand.hbm [shape: f32[2,1,16], index: 3, kind: output, shape index: {1}]  }
   0x1   :  { %11 = vsyncpa [#allocation9 + $0x1], 0 }
   0x2   :  { %12 = vsyncpa [#allocation12], 0 }
   0x3   :  { %13 = vsyncpa [#allocation10], 0 }
   0x4   :  { %15 = vsyncpa [#allocation10 + $0x1], 0  ;;  %s993_s12 = smov 0   ;;  %s995_s13 = smov 0  }
   0x5   :  { %s997_s14 = smov 0   ;;  %s999_s15 = smov 0  }
   0x6   :  { %s1001_s16 = smov 0   ;;  %s1003_s17 = smov 0  }
   0x7 LB: > { %s672_s18 = sadd.s32 4294967295, %s962_s17   ;;  %s673_s19 = sadd.s32 4294967294, %s962_s17   ;;  %s962_s17 = sphi %s1003_s17, %s21_s17   ;;  %s958_s16 = sphi %s1001_s16, %s1228_s16   ;;  %s954_s15 = sphi %s999_s15, %s1227_s15   ;;  %s950_s14 = sphi %s997_s14, %s1226_s14   ;;  %s946_s13 = sphi %s995_s13, %s1225_s13   ;;  %s942_s12 = sphi %s993_s12, %s1224_s12  }
   0x8   : > { %p55_p0 = scmp.ne.s32.totalorder %s946_s13, %s942_s12  ;;  %p1027_p1 = scmp.eq.s32.totalorder %s672_s18, 0 }
   0x9   : > { %p1031_p2 = scmp.eq.s32.totalorder %s672_s18, 1  ;;  %p132_p3 = scmp.eq.s32.totalorder %s673_s19, 1 }
   0xa   : > { %p1037_p4 = por %p1027_p1, %p55_p0  ;;  %p674_p5 = scmp.ge.s32.totalorder %s962_s17, 1 }
   0xb   : > { %p1042_p6 = por %p132_p3, %p55_p0  ;;  %p139_p7 = scmp.lt.s32.totalorder %s962_s17, 3 }
   0xc   : > { %s1214_s22 = scalar_select %p1037_p4, 1, 0 }
   0xd   : > { %s1215_s23 = scalar_select %p1042_p6, 1, 0 }
   0xe   : > { %p1047_p8 = pnand %p674_p5, %p139_p7  ;;  %s964_s25 = smov [#allocation11]  }
   0xf   : > { %s151_s26 = sshll.u32 %s964_s25, 4  ;;  %s33_s28 = sadd.s32 1, %s958_s16  ;;  %s152_s26 = int_to_ptr.vmem [resolvable:$true] %s151_s26 }
  0x10   : > { %p733_p9 = pneg %p1047_p8  ;;  %s835_s29 = scalar_lea.vmem %s152_s26, 256 }
  0x11   : > { %p836_p13 = scmp.ne.s32.totalorder %s152_s26, %s835_s29  ;;  %p843_p5 = scmp.lt.s32.totalorder %s152_s26, %s152_s26 }
  0x12   : > { %p1056_p11 = pnand %p733_p9, %p1027_p1  ;;  %p844_p7 = scmp.lt.s32.totalorder %s835_s29, %s835_s29 }
  0x14   : > { %p826_p12 = pneg %p1056_p11  ;;  %p845_p6 = por %p844_p7, %p843_p5 }
  0x16   : > { %p838_p0 = pnand %p836_p13, %p826_p12 }
  0x18   : > { %p839_p3 = pneg %p838_p0 }
  0x1a   : > { %p846_p4 = pnand %p845_p6, %p839_p3 }
  0x1c   : > { %849 = shalt.err (!%p846_p4)
}
  0x1d   : > { %s965_s30 = smov 128   ;;  %s966_s4 = smov 8  }
  0x1e   : > { %736 = dma.hbm_to_vmem [thread:$0]  (!%p1056_p11), %s1208_s1, 256, %s152_s26, [#allocation12], %s965_s30, %s965_s30, %s966_s4  }
  0x1f   : > { %p35_p6 = scmp.ge.s32.totalorder %s33_s28, 2  ;;  %s42_s7 = sadd.s32 1, %s950_s14 }
  0x20   : > { %p49_p4 = scmp.ne.s32.totalorder %s950_s14, %s946_s13  ;;  %p50_p9 = scmp.eq.s32.totalorder %s962_s17, 0 }
  0x21   : > { %s1230_s28 = smov (%p35_p6, %s33_s28), 0  ;;  %p746_p0 = scmp.lt.s32.totalorder %s962_s17, 2 }
  0x22   : > { %p1074_p12 = por %p50_p9, %p49_p4  ;;  %p1080_p13 = por %p1031_p2, %p49_p4 }
  0x23   : > { %s39_s10 = ssub.s32 %s958_s16, %s1230_s28  ;;  %s165_s11 = sand.u32 1, %s950_s14  }
  0x24   : > { %p40_p11 = scmp.eq.s32.totalorder %s39_s10, 0  ;;  %s677_s18 = sshll.u32 %s165_s11, 3 }
  0x25   : > { %s678_s25 = sshll.u32 %s958_s16, 7  ;;  %s169_s30 = scalar_lea.vmem [#allocation8], %s677_s18 }
  0x26   : > { %s1089_s19 = scalar_select %p40_p11, %s950_s14, %s42_s7  }
  0x27   : > { %s175_s29 = scalar_lea.hbm %s1207_s0, %s678_s25  ;;  %s177_s4 = sshll.u32 %s169_s30, 4  ;;  %s178_s4 = int_to_ptr.vmem [resolvable:$true] %s177_s4 }
  0x28   : > { %p1097_p2 = pnand %p746_p0, %p1074_p12  ;;  %s166_s5 = scalar_lea.sflag [#allocation9], %s165_s11 }
  0x29   : > { %s863_s6 = scalar_lea.vmem %s178_s4, 128  ;;  %s967_s7 = smov [#allocation8]  }
  0x2a   : > { %p852_p3 = pneg %p1097_p2  ;;  %p864_p5 = scmp.ne.s32.totalorder %s178_s4, %s863_s6 }
  0x2b   : > { %s868_s10 = sshll.u32 %s967_s7, 4  ;;  %s869_s10 = int_to_ptr.vmem [resolvable:$false] %s868_s10 }
  0x2c   : > { %p866_p7 = pnand %p864_p5, %p852_p3  ;;  %s870_s25 = scalar_lea.vmem %s869_s10, 256 }
  0x2d   : > { %p871_p4 = scmp.lt.s32.totalorder %s178_s4, %s869_s10  ;;  %p872_p9 = scmp.lt.s32.totalorder %s870_s25, %s863_s6 }
  0x2e   : > { %p867_p6 = pneg %p866_p7 }
  0x2f   : > { %p873_p11 = por %p872_p9, %p871_p4 }
  0x31   : > { %p874_p10 = pnand %p873_p11, %p867_p6 }
  0x33   : > { %877 = shalt.err (!%p874_p10)
}
  0x34   : > { %740 = dma.hbm_to_vmem [thread:$0]  (!%p1097_p2), %s175_s29, 128, %s178_s4, %s166_s5  }
  0x35   : > { %186 = sbr.rel (%p1047_p8) target bundleno = 983 (0x3d7), region = 28  ;;  %s1108_s8 = sand.u32 (!%p1047_p8), 1, %s946_s13  }
  0x36   : > { %s680_s11 = sshll.u32 (!%p1047_p8), %s1108_s8, 3  ;;  %s189_s18 = scalar_lea.sflag (!%p1047_p8), [#allocation9], %s1108_s8 }
  0x37   : > { %s192_s26 = scalar_lea.vmem (!%p1047_p8), [#allocation8], %s680_s11  ;;  %p1221_p12 = scmp.ne.s32.totalorder (!%p1047_p8), %s1214_s22, 0 }
  0x3a   : > { %929 = dma.done.wait (%p1221_p12), %s189_s18, 128  }
  0x3b   : > { %931 = vsyncadd (%p1221_p12), %s189_s18, 4294967168 }
  0x3c   : > { %933 = dma.done.wait (%p1027_p1), [#allocation12], 256  }
  0x3d   : > { %935 = vsyncadd (%p1027_p1), [#allocation12], 4294967040  ;;  %v230_v0 = vld [vmem:[#allocation11] sm:$0xff]  ;;  %vm234_vm0 = vcmask 261120   ;;  %v231_v1 = vld [vmem:[#allocation11 + $0x8] sm:$0xff]  ;;  %v968_v9 = vmov 0.0   ;;  %v475_v60 = vlaneseq }
  0x3e   : > { %v278_v2 = vld [vmem:[%s192_s26] sm:$0xff]  ;;  %v232_v3 = vmul.f32 %v230_v0, %v230_v0  ;;  %v233_v4 = vmul.f32 %v231_v1, %v231_v1  ;;  %711 = vmatprep.subr.bf16.mxu1 %v968_v9  ;;  %705 = vmatprep.subr.bf16.mxu0 %v968_v9  ;;  %vm969_vm1 = vmmov 0   ;;  %vm253_vm2 = vcmask 257024   ;;  %s691_s20 = sshll.u32 %s954_s15, 3  ;;  %s692_s24 = sshll.u32 %s954_s15, 4 }
  0x3f   : > { %v279_v5 = vmul.f32 %v278_v2, %v278_v2  ;;  %713 = vmatprep.mubr.msk.bf16.mxu1 %vm969_vm1, %v968_v9  ;;  %707 = vmatprep.mubr.msk.bf16.mxu0 %vm969_vm1, %v968_v9  ;;  %vm272_vm3 = vcmask 0   ;;  %v970_v36 = vmov -inf   ;;  %vm447_vm4 = vcmask 130048   ;;  %s440_s22 = scalar_lea.vmem [#allocation4], %s691_s20  ;;  %s220_s27 = scalar_lea.vmem [#allocation13], %s1108_s8 }
  0x40   : > { %v235_v6 = vsel %vm234_vm0, %v232_v3, 0.0  ;;  %v238_v8 = vsel %vm234_vm0, %v233_v4, 0.0  ;;  %273 = vst.msk [vmem:[#allocation5] sm:$0x1] %vm272_vm3, %v970_v36  ;;  %v971_v56 = vmov 0   ;;  %vm276_vm5 = vcmask 7168   ;;  %s563_s21 = scalar_lea.hbm %s1210_s3, %s692_s24 }
  0x41   : > { %v281_v7 = vsel %vm234_vm0, %v279_v5, 0.0  ;;  %236 = vadd.xlane.f32.xlu0 %v235_v6  ;;  %804 = vset.pattern.permute.xlu1 %v971_v56  ;;  %277 = vst.msk [vmem:[#allocation7] sm:$0xff] %vm276_vm5, %v968_v9  ;;  %vm274_vm6 = vcmask 122880   ;;  %s565_s29 = sshll.u32 %s220_s27, 4  ;;  %s550_s5 = scalar_lea.sflag [#allocation10], %s1108_s8  ;;  %s566_s29 = int_to_ptr.vmem [resolvable:$true] %s565_s29 }
  0x42   : > { %282 = vadd.xlane.f32.xlu1 %v281_v7  ;;  %805 = vset.pattern.permute.xlu0 %v971_v56  ;;  %275 = vst.msk [vmem:[#allocation6] sm:$0x1] %vm274_vm6, %v968_v9  ;;  %s878_s6 = scalar_lea.vmem %s566_s29, 16  ;;  %s972_s7 = smov [#allocation13]  }
  0x43   : > { %p879_p1 = scmp.ne.s32.totalorder %s566_s29, %s878_s6  ;;  %s882_s10 = sshll.u32 %s972_s7, 4  ;;  %s883_s10 = int_to_ptr.vmem [resolvable:$false] %s882_s10 }
  0x44   : > { %s884_s25 = scalar_lea.vmem %s883_s10, 32  ;;  %p885_p0 = scmp.lt.s32.totalorder %s566_s29, %s883_s10 }
  0x45   : > { %239 = vadd.xlane.f32.xlu0 %v238_v8  ;;  %p880_p8 = pnand %p879_p1, %p1080_p13  ;;  %p886_p2 = scmp.lt.s32.totalorder %s884_s25, %s878_s6 }
  0x47   : > { %v466_v3 = vld [vmem:[#allocation5] sm:$0x1]  ;;  %p881_p10 = pneg %p880_p8  ;;  %p887_p3 = por %p886_p2, %p885_p0 }
  0x49   : > { %p888_p5 = pnand %p887_p3, %p881_p10 }
  0xca   : > { %v237_v10 = vpop.xlane.xlu0 %236 }
  0xcb   : > { %808 = vrsqrt.f32 %v237_v10  ;;  %v283_v14 = vpop.xlane.xlu1 %282 }
  0xce   : > { %v240_v11 = vpop.xlane.xlu0 %239 }
  0xcf   : > { %810 = vrsqrt.f32 %v240_v11 }
  0xd0   : > { %812 = vrsqrt.f32 %v283_v14 }
  0xd8   : > { %v809_v12 = vpop.eup %808 }
  0xd9   : > { %v243_v13 = vmul.f32 %v809_v12, %v230_v0  ;;  %v476_v0 = vshrl.u32 %v475_v60, 7 }
  0xdb   : > { %v695_v15 = vpack.c.bf16 %v243_v13, %v243_v13  ;;  %270 = vst.msk [vmem:[#allocation4] sm:$0xff] %vm234_vm0, %v243_v13  ;;  %v1147_v4 = vsub.s32 0, %v476_v0 }
  0xdc   : > { %v811_v16 = vpop.eup %810 }
  0xdd   : > { %254 = vst.msk [vmem:[#allocation2] sm:$0xf] %vm253_vm2, %v695_v15  ;;  %v244_v17 = vmul.f32 %v811_v16, %v231_v1  ;;  %v813_v27 = vpop.eup %812 }
  0xde   : > { %v285_v29 = vmul.f32 %v813_v27, %v278_v2 }
  0xdf   : > { %v245_v18 = vpack.c.bf16 %v244_v17, %v243_v13  ;;  %v696_v19 = vpack.c.bf16 %v244_v17, %v244_v17  ;;  %271 = vst.msk [vmem:[#allocation4 + $0x8] sm:$0xff] %vm234_vm0, %v244_v17 }
  0xe0   : > { %v286_v31 = vpack.c.bf16 %v285_v29, %v285_v29 }
  0xe1   : > { %255 = vst.msk [vmem:[#allocation2 + $0x4] sm:$0xf] %vm253_vm2, %v696_v19  ;;  %v256_v20 = vunpack.c.l.bf16 %v245_v18  ;;  %v257_v21 = vunpack.c.h.bf16 %v245_v18 }
  0xe2   : > { %v287_v33 = vunpack.c.l.bf16 %v286_v31 }
  0xe3   : > { %v258_v22 = vsub.f32 %v243_v13, %v256_v20  ;;  %v259_v23 = vsub.f32 %v244_v17, %v257_v21 }
  0xe4   : > { %v288_v34 = vsub.f32 %v285_v29, %v287_v33 }
  0xe5   : > { %v697_v24 = vpack.c.bf16 %v258_v22, %v258_v22  ;;  %v698_v25 = vpack.c.bf16 %v259_v23, %v259_v23  ;;  %v460_v23 = vld [vmem:[#allocation7] sm:$0xff] }
  0xe6   : > { %v289_v35 = vpack.c.bf16 %v288_v34, %v288_v34  ;;  %v441_v49 = vld [vmem:[%s440_s22] sm:$0xff] }
  0xe7   : > { %268 = vst.msk [vmem:[#allocation3] sm:$0xf] %vm253_vm2, %v697_v24  ;;  %269 = vst.msk [vmem:[#allocation3 + $0x4] sm:$0xf] %vm253_vm2, %v698_v25  ;;  %v442_v53 = vmul.f32 %v441_v49, %v285_v29 }
  0xe8   : > { %v806_v26 = vld [vmem:[#allocation2] sm:$0xff]  }
  0xe9   : > { %v351_v28 = vsel %vm234_vm0, %v806_v26, 0  ;;  %v443_v55 = vsel %vm234_vm0, %v442_v53, 0.0 }
  0xea   : > { %712 = vmatpush3.bf16.xpose.msra.mxu1 %v351_v28 }
  0xee   : > { %v807_v30 = vld [vmem:[#allocation3] sm:$0xff]  }
  0xef   : > { %v303_v32 = vsel %vm234_vm0, %v807_v30, 0 }
  0xf0   : > { %706 = vmatpush3.bf16.xpose.msra.mxu0 %v303_v32 }
  0xf1   : > { %714 = vmatmul.mubr.msk.bf16.vlgmr.msra.gmra.mxu1 %vm234_vm0, %v286_v31  ;;  %717 = vmatprep.subr.bf16.mxu0 %v968_v9 }
  0xf7   : > { %708 = vmatmul.mubr.msk.bf16.vlgmr.msra.gmra.mxu0 %vm234_vm0, %v286_v31 }
  0xf8   : > { %718 = vmatpush3.bf16.xpose.msra.mxu0 %v351_v28  ;;  %719 = vmatprep.mubr.msk.bf16.mxu0 %vm969_vm1, %v968_v9 }
  0xff   : > { %720 = vmatmul.mubr.msk.bf16.vlgmr.msra.gmra.mxu0 %vm234_vm0, %v289_v35 }
 0x1b1   : > { %v387_v37 = vpop.f32.mrf.mxu1 }
 0x1b3   : > { %v715_v38 = vpop.f32.mrf.mxu1 }
 0x1b5   : > { %v390_v39 = vpop.f32.mrf.mxu1 }
 0x1b7   : > { %v339_v40 = vpop.f32.mrf.mxu0  ;;  %v716_v41 = vpop.f32.mrf.mxu1 }
 0x1b8   : > { %v388_v45 = vadd.f32 %v387_v37, %v339_v40 }
 0x1b9   : > { %v709_v42 = vpop.f32.mrf.mxu0 }
 0x1bb   : > { %v342_v43 = vpop.f32.mrf.mxu0 }
 0x1bc   : > { %v483_v43 = vld [vmem:[#allocation6] sm:$0x1] }
 0x1bd   : > { %v710_v44 = vpop.f32.mrf.mxu0 }
 0x1bf   : > { %v430_v46 = vpop.f32.mrf.mxu0 }
 0x1c0   : > { %v436_v47 = vadd.f32 %v430_v46, %v388_v45 }
 0x1c1   : > { %v721_v48 = vpop.f32.mrf.mxu0 }
 0x1c2   : > { %v437_v50 = vmul.f32 14.285714, %v436_v47 }
 0x1c3   : > { %v433_v51 = vpop.f32.mrf.mxu0 }
 0x1c4   : > { %v448_v52 = vsel %vm447_vm4, %v437_v50, -inf }
 0x1c5   : > { %449 = vmax.xlane.f32.xlu1 %v448_v52  ;;  %v722_v54 = vpop.f32.mrf.mxu0 }
 0x1c9   : > { %444 = vadd.xlane.f32.xlu1 %v443_v55 }
 0x24e   : > { %v450_v57 = vpop.xlane.xlu1 %449 }
 0x24f   : > { %v451_v58 = vsub.f32 %v437_v50, %v450_v57  ;;  %v467_v59 = vrot.slane %v450_v57, 4 }
 0x251   : > { %v452_v61 = vmul.f32 1.442695, %v451_v58  ;;  %v468_v62 = vmax.f32 %v450_v57, %v467_v59 }
 0x252   : > { %v445_v19 = vpop.xlane.xlu1 %444 }
 0x253   : > { %814 = vpow2.f32 %v452_v61  ;;  %v469_v63 = vrot.slane %v468_v62, 2  ;;  %v446_v21 = vmul.f32 14.285714, %v445_v19 }
 0x255   : > { %v470_v1 = vmax.f32 %v468_v62, %v469_v63 }
 0x257   : > { %v471_v2 = vrot.slane %v470_v1, 1 }
 0x259   : > { %v472_v5 = vmax.f32 %v470_v1, %v471_v2 }
 0x25b   : > { %v473_v6 = vmax.f32 %v466_v3, %v472_v5 }
 0x25d   : > { %v478_v7 = vrot.slane %v473_v6, %v1147_v4  ;;  %v484_v8 = vsub.f32 %v466_v3, %v473_v6  ;;  %514 = vst.msk [vmem:[#allocation5] sm:$0x1] %vm272_vm3, %v473_v6 }
 0x25f   : > { %v480_v10 = vsub.f32 %v450_v57, %v478_v7  ;;  %v485_v28 = vmul.f32 1.442695, %v484_v8 }
 0x260   : > { %v815_v11 = vpop.eup %814 }
 0x261   : > { %v481_v12 = vmul.f32 1.442695, %v480_v10  ;;  %v454_v13 = vsel %vm447_vm4, %v815_v11, 0.0 }
 0x262   : > { %455 = vadd.xlane.f32.xlu0 %v454_v13 }
 0x263   : > { %816 = vpow2.f32 %v481_v12 }
 0x264   : > { %v531_v15 = vld [vmem:[#allocation5] sm:$0x1] }
 0x270   : > { %v817_v14 = vpop.eup %816 }
 0x271   : > { %499 = vperm.xlu1 %804, %v817_v14  }
 0x275   : > { %537 = vperm.xlu1 %804, %v531_v15  }
 0x2eb   : > { %v456_v16 = vpop.xlane.xlu0 %455 }
 0x2ec   : > { %818 = vlog2.f32 %v456_v16  ;;  %v500_v30 = vpop.permute.xlu1 %499 }
 0x2ed   : > { %820 = vpow2.f32 %v485_v28  ;;  %v502_v31 = vmul.f32 %v815_v11, %v500_v30 }
 0x2ef   : > { %v503_v32 = vsel %vm447_vm4, %v502_v31, 0.0 }
 0x2f0   : > { %v504_v33 = vrot.slane %v503_v32, 4  ;;  %v538_v51 = vpop.permute.xlu1 %537 }
 0x2f1   : > { %v543_v53 = vrot.slane %v538_v51, %v1147_v4 }
 0x2f2   : > { %v505_v34 = vadd.f32 %v504_v33, %v503_v32 }
 0x2f4   : > { %v506_v35 = vrot.slane %v505_v34, 2 }
 0x2f6   : > { %v507_v38 = vadd.f32 %v506_v35, %v505_v34 }
 0x2f8   : > { %v508_v41 = vrot.slane %v507_v38, 1 }
 0x2f9   : > { %v819_v17 = vpop.eup %818 }
 0x2fa   : > { %v458_v18 = vmul.f32 0.6931472, %v819_v17  ;;  %v821_v29 = vpop.eup %820  ;;  %v509_v47 = vadd.f32 %v508_v41, %v507_v38 }
 0x2fc   : > { %v459_v20 = vadd.f32 %v458_v18, %v450_v57 }
 0x2fe   : > { %v461_v22 = vmul.f32 0.5, %v459_v20 }
 0x300   : > { %v462_v24 = vsub.f32 %v461_v22, %v446_v21 }
 0x302   : > { %v463_v25 = vadd.f32 %v462_v24, %v460_v23 }
 0x304   : > { %465 = vst.msk [vmem:[#allocation7] sm:$0xff] %vm276_vm5, %v463_v25 }
 0x30b   : > { %v518_v26 = vld [vmem:[#allocation7] sm:$0xff] }
 0x30c   : > { %v519_v27 = vsel %vm276_vm5, %v518_v26, 0.0 }
 0x30d   : > { %520 = vadd.xlane.f32.xlu0 %v519_v27 }
 0x323   : > { %489 = vperm.xlu0 %805, %v821_v29  }
 0x396   : > { %v521_v36 = vpop.xlane.xlu0 %520 }
 0x397   : > { %v522_v37 = vrot.slane %v521_v36, 4 }
 0x399   : > { %v523_v39 = vadd.f32 %v522_v37, %v521_v36 }
 0x39b   : > { %v524_v40 = vrot.slane %v523_v39, 2 }
 0x39d   : > { %v525_v42 = vadd.f32 %v524_v40, %v523_v39 }
 0x39e   : > { %v490_v9 = vpop.permute.xlu0 %489 }
 0x39f   : > { %v495_v44 = vrot.slane %v490_v9, %v1147_v4  ;;  %v526_v45 = vrot.slane %v525_v42, 1 }
 0x3a1   : > { %v496_v46 = vmul.f32 %v495_v44, %v483_v43  ;;  %v527_v48 = vadd.f32 %v526_v45, %v525_v42 }
 0x3a3   : > { %v510_v49 = vadd.f32 %v509_v47, %v496_v46  ;;  %723 = vpush %v527_v48 }
 0x3a5   : > { %512 = vst.msk [vmem:[#allocation6] sm:$0x1] %vm274_vm6, %v510_v49 }
 0x3ac   : > { %v532_v50 = vld [vmem:[#allocation6] sm:$0x1] }
 0x3ad   : > { %822 = vlog2.f32 %v532_v50 }
 0x3ba   : > { %v823_v52 = vpop.eup %822 }
 0x3bb   : > { %v534_v54 = vmul.f32 0.6931472, %v823_v52 }
 0x3bd   : > { %v544_v55 = vadd.f32 %v543_v53, %v534_v54 }
 0x3bf   : > { %545 = vst.msk [vmem:[%s220_s27] sm:$0x1] %vm274_vm6, %v544_v55 }
 0x3c0   : > { %891 = shalt.err (!%p888_p5)
}
 0x3c1   : > { %s892_s11 = scalar_lea.hbm %s563_s21, 16  ;;  %s896_s26 = scalar_lea.hbm %s1210_s3, 32 }
 0x3c2   : > { %p893_p7 = scmp.ne.s32.totalorder %s563_s21, %s892_s11  ;;  %p897_p9 = scmp.lt.s32.totalorder %s563_s21, %s1210_s3 }
 0x3c3   : > { %p898_p11 = scmp.lt.s32.totalorder %s896_s26, %s892_s11 }
 0x3c4   : > { %p894_p6 = pnand %p893_p7, %p1080_p13 }
 0x3c5   : > { %p899_p12 = por %p898_p11, %p897_p9 }
 0x3c6   : > { %p895_p4 = pneg %p894_p6 }
 0x3c8   : > { %p900_p1 = pnand %p899_p12, %p895_p4 }
 0x3ca   : > { %903 = shalt.err (!%p900_p1)
}
 0x3cb   : > { %731 = dma.vmem_to_hbm [thread:$0]  (%p1080_p13), %s566_s29, 16, %s563_s21, %s550_s5  }
 0x3cc   : > { %p222_p8 = scmp.lt.s32.totalorder %s954_s15, 1 }
 0x3ce   : > { %s1232_s15 = smov (!%p222_p8, %s954_s15), 1 }
 0x3cf   : > { %s224_s30 = scalar_lea.vmem %s1209_s2, %s1232_s15 }
 0x3d4   : > { %s724_s4 = spop %723 }
 0x3d5   : > { %v529_v56 = vstv %s724_s4 }
 0x3d6   : > { %530 = vst.msk [vmem:[%s224_s30] sm:$0x1] %vm272_vm3, %v529_v56 }
 0x3d7 PF: > { %s583_s6 = sand.u32 1, %s942_s12   ;;  %p1222_p10 = scmp.ne.s32.totalorder %s1215_s23, 0 }
 0x3d8   : > { %p1223_p0 = scmp.ge.s32.totalorder %s962_s17, 2  ;;  %s584_s9 = scalar_lea.sflag [#allocation10], %s583_s6 }
 0x3da   : > { %p742_p2 = pnand %p1223_p0, %p1222_p10 }
 0x3dc   : > { %p743_p3 = pneg %p742_p2 }
 0x3de   : > { %937 = dma.done.wait (%p743_p3), %s584_s9, 16  }
 0x3df   : > { %939 = vsyncadd (%p743_p3), %s584_s9, 4294967280  ;;  %s21_s17 = sadd.s32 1, %s962_s17   ;;  %s1224_s12 = smov %s946_s13 }
 0x3e0   : > { %p18_p13 = scmp.ge.s32.totalorder %s21_s17, 4   ;;  %s1225_s13 = smov %s950_s14 }
 0x3e1   : > { %s1226_s14 = smov %s1089_s19  ;;  %s1227_s15 = smov %s958_s16 }
 0x3e2   : > { %s1228_s16 = smov %s1230_s28  ;;  %20 = sbr.rel (!%p18_p13) target bundleno = 7 (0x7), region = 98 }
 0x3e7   :  { %588 = vsyncpa [#allocation9], 1 }
 0x3e8   :  { %590 = vsyncpa [#allocation9 + $0x1], 1 }
 0x3e9   :  { %591 = vsyncpa [#allocation12], 1 }
 0x3ea   :  { %592 = vsyncpa [#allocation10], 1 }
 0x3eb   :  { %594 = vsyncpa [#allocation10 + $0x1], 1 }

</bundles_post_ra>
